<compile_context>
chip_gen: v7x
topology: tpu7x:2x2x1
jax: 0.10.0
libtpu: 0.0.40
codegen_flags: <defaults>
</compile_context>

<pallas_src>
import math
import numpy as np
import jax
import jax.numpy as jnp
from jax.experimental import pallas as pl
from jax.experimental.pallas import tpu as pltpu


def num_bond_features():
    # matches the original neural-fingerprint codebase
    return 6


def _nfp_output_kernel(x_ref, s_ref, w_ref, bias_ref, o_ref):
    # x_ref   : (TB*N, K)   fused [atom | flattened-bond] features for TB molecules
    # s_ref   : (TB, TB*N)  block-diagonal mask/aggregation matrix
    # w_ref   : (K, fpl)    fused weights [w_atom ; tile(w_bond, D)]
    # bias_ref: (1, fpl)
    # o_ref   : (TB, fpl)
    z = jnp.dot(x_ref[...], w_ref[...], preferred_element_type=jnp.float32) + bias_ref[...]
    fp = jax.nn.sigmoid(z)                                                    # (TB*N, fpl)
    # masked per-molecule sum over atoms as a second MXU matmul
    o_ref[...] = jnp.dot(s_ref[...], fp, preferred_element_type=jnp.float32)  # (TB, fpl)


def nfp_output(a, b, e, w, bias, *, layer, tb=None):
    B, N, _ = a.shape
    _, _, D, nbf = b.shape
    fpl = w.shape[1]
    K = layer + D * nbf

    # ---- wrapper-side layout plumbing (no heavy compute hoisted) ----
    # Fuse the bond-sum into the matmul:   sbf @ w_b == b_flat @ tile(w_b, D)
    x = jnp.concatenate([a, b.reshape(B, N, D * nbf)], axis=-1)                    # (B, N, K)
    w_cat = jnp.concatenate([w[:layer], jnp.tile(w[layer:], (D, 1))], axis=0)      # (K, fpl)
    # Per-atom mask (atom has at least one bond) — replaces in-kernel e/deg reduce.
    mask = jnp.any(e != -1, axis=-1).astype(jnp.float32)                           # (B, N)

    # Pad atoms to a multiple of 8 (sublane alignment); padded atoms carry zero mask.
    Np = ((N + 7) // 8) * 8
    if Np != N:
        x = jnp.pad(x, ((0, 0), (0, Np - N), (0, 0)))
        mask = jnp.pad(mask, ((0, 0), (0, Np - N)))

    # ---- batching: TB molecules per grid step (target ~256 MXU rows / step) ----
    if tb is None:
        tb = max(1, 256 // Np)
    if tb >= B:
        tb = B                       # single grid step, all blocks equal full arrays
    else:
        tb = max(8, (tb // 8) * 8)   # multiple of 8 -> sublane-aligned row blocks
    G = math.ceil(B / tb)
    Bp = G * tb
    if Bp != B:
        # zero-pad extra molecules; their mask rows are 0 so they contribute exactly 0
        x = jnp.pad(x, ((0, Bp - B), (0, 0), (0, 0)))
        mask = jnp.pad(mask, ((0, Bp - B), (0, 0)))

    x2d = x.reshape(Bp * Np, K)                                                    # (Bp*Np, K)

    # Block-diagonal aggregation matrix: S[g*tb+t, t'*Np+n] = (t == t') * mask[g*tb+t', n]
    eye = jnp.eye(tb, dtype=jnp.float32)
    s = (eye[None, :, :, None] * mask.reshape(G, 1, tb, Np)).reshape(G * tb, tb * Np)

    out = pl.pallas_call(
        _nfp_output_kernel,
        out_shape=jax.ShapeDtypeStruct((Bp, fpl), jnp.float32),
        grid_spec=pltpu.PrefetchScalarGridSpec(
            num_scalar_prefetch=0,
            grid=(G,),
            in_specs=[
                pl.BlockSpec((tb * Np, K), lambda i: (i, 0)),    # fused features
                pl.BlockSpec((tb, tb * Np), lambda i: (i, 0)),   # mask/aggregation matrix
                pl.BlockSpec((K, fpl), lambda i: (0, 0)),        # fused weights (resident)
                pl.BlockSpec((1, fpl), lambda i: (0, 0)),        # bias (resident)
            ],
            out_specs=pl.BlockSpec((tb, fpl), lambda i: (i, 0)),
        ),
        compiler_params=pltpu.CompilerParams(
            dimension_semantics=("parallel",),
        ),
    )(x2d, s, w_cat, bias)

    return out[:B]


def nfp_output_ref(a, b, e, w, bias):
    # pure-JAX reference mirroring the PyTorch forward
    deg = jnp.sum((e != -1).astype(jnp.int32), axis=-1, keepdims=True)
    mask = (deg != 0).astype(jnp.float32)
    sbf = jnp.sum(b, axis=-2)
    summed = jnp.concatenate([a, sbf], axis=-1)
    fp = jax.nn.sigmoid(summed @ w + bias) * mask
    return jnp.sum(fp, axis=-2)


if __name__ == "__main__":
    nbf = num_bond_features()
    layer = 32       # atom feature dim
    fpl = 32         # fingerprint length
    N = 16           # atoms per molecule
    D = 8            # max degree (neighbor slots)

    def make_inputs(key, B):
        k_a, k_b, k_e, k_w = jax.random.split(key, 4)
        a = jax.random.normal(k_a, (B, N, layer), dtype=jnp.float32)
        bb = jax.random.normal(k_b, (B, N, D, nbf), dtype=jnp.float32)
        e = jax.random.randint(k_e, (B, N, D), -1, N, dtype=jnp.int32)  # -1 = no bond
        # xavier_normal_ on w, constant_ 0.01 on bias
        fan_in = layer + nbf
        std = float(np.sqrt(2.0 / (fan_in + fpl)))
        w = std * jax.random.normal(k_w, (fan_in, fpl), dtype=jnp.float32)
        bias = jnp.full((1, fpl), 0.01, dtype=jnp.float32)
        return a, bb, e, w, bias

    # Case 1: small batch (B=2) — single grid step, blocks equal full arrays.
    a, bb, e, w, bias = make_inputs(jax.random.PRNGKey(0), 2)
    out = jax.block_until_ready(nfp_output(a, bb, e, w, bias, layer=layer))
    ref = nfp_output_ref(a, bb, e, w, bias)
    np.testing.assert_allclose(np.asarray(out), np.asarray(ref), rtol=1e-5, atol=2e-5)

    # Case 2: batched path (B=20 -> TB=16, 2 grid steps, exercises zero-padding).
    a, bb, e, w, bias = make_inputs(jax.random.PRNGKey(1), 20)
    out = jax.block_until_ready(nfp_output(a, bb, e, w, bias, layer=layer))
    ref = nfp_output_ref(a, bb, e, w, bias)
    np.testing.assert_allclose(np.asarray(out), np.asarray(ref), rtol=1e-5, atol=2e-5)

    print("KERNEL_OK")
</pallas_src>

<mosaic_0001>
module attributes {stable_mosaic.version = 11 : i64} {
  func.func @_nfp_output_kernel(%arg0: i32, %arg1: memref<32x80xf32, #tpu.memory_space<vmem>>, %arg2: memref<2x32xf32, #tpu.memory_space<vmem>>, %arg3: memref<80x32xf32, #tpu.memory_space<vmem>>, %arg4: memref<1x32xf32, #tpu.memory_space<vmem>>, %arg5: memref<2x32xf32, #tpu.memory_space<vmem>>) attributes {dimension_semantics = [#tpu.dimension_semantics<parallel>], iteration_bounds = array<i64: 1>, scalar_prefetch = 0 : i64, scratch_operands = 0 : i64, tpu.core_type = #tpu.core_type<tc>, window_params = [{transform_indices = @transform_0, window_bounds = array<i64: 32, 80>}, {transform_indices = @transform_1, window_bounds = array<i64: 2, 32>}, {pipeline_mode = #tpu.pipeline_mode<synchronous>, transform_indices = @transform_2, window_bounds = array<i64: 80, 32>}, {pipeline_mode = #tpu.pipeline_mode<synchronous>, transform_indices = @transform_3, window_bounds = array<i64: 1, 32>}, {transform_indices = @transform_4, window_bounds = array<i64: 2, 32>}]} {
    %c0 = arith.constant 0 : index
    %c0_0 = arith.constant 0 : index
    %0 = vector.load %arg1[%c0, %c0_0] : memref<32x80xf32, #tpu.memory_space<vmem>>, vector<32x80xf32>
    %c0_1 = arith.constant 0 : index
    %c0_2 = arith.constant 0 : index
    %1 = vector.load %arg3[%c0_1, %c0_2] : memref<80x32xf32, #tpu.memory_space<vmem>>, vector<80x32xf32>
    %cst = arith.constant dense<0.000000e+00> : vector<32x32xf32>
    %2 = tpu.matmul %0, %1, %cst {dimension_numbers = #tpu.dot_dimension_numbers<[1], [0], [0], [1], [0, 0, 1, 1], [], []>} : vector<32x80xf32>, vector<80x32xf32>, vector<32x32xf32> -> vector<32x32xf32>
    %c0_3 = arith.constant 0 : index
    %c0_4 = arith.constant 0 : index
    %3 = vector.load %arg4[%c0_3, %c0_4] : memref<1x32xf32, #tpu.memory_space<vmem>>, vector<1x32xf32>
    %4 = vector.broadcast %3 : vector<1x32xf32> to vector<32x32xf32>
    %5 = arith.addf %2, %4 : vector<32x32xf32>
    %6 = arith.negf %5 : vector<32x32xf32>
    %7 = math.exp %6 : vector<32x32xf32>
    %cst_5 = arith.constant 1.000000e+00 : f32
    %8 = vector.broadcast %cst_5 : f32 to vector<32x32xf32>
    %9 = arith.addf %8, %7 : vector<32x32xf32>
    %10 = arith.divf %8, %9 : vector<32x32xf32>
    %c0_6 = arith.constant 0 : index
    %c0_7 = arith.constant 0 : index
    %11 = vector.load %arg2[%c0_6, %c0_7] : memref<2x32xf32, #tpu.memory_space<vmem>>, vector<2x32xf32>
    %cst_8 = arith.constant dense<0.000000e+00> : vector<2x32xf32>
    %12 = tpu.matmul %11, %10, %cst_8 {dimension_numbers = #tpu.dot_dimension_numbers<[1], [0], [0], [1], [0, 0, 1, 1], [], []>} : vector<2x32xf32>, vector<32x32xf32>, vector<2x32xf32> -> vector<2x32xf32>
    %c0_9 = arith.constant 0 : index
    %c0_10 = arith.constant 0 : index
    %13 = vector.load %arg5[%c0_9, %c0_10] : memref<2x32xf32, #tpu.memory_space<vmem>>, vector<2x32xf32>
    tpu.vector_store %arg5[%c0_9, %c0_10], %12 {strides = array<i32>} : memref<2x32xf32, #tpu.memory_space<vmem>>, vector<2x32xf32>,
    return
  }
  func.func @transform_0(%arg0: i32) -> (i32, i32) {
    %c0_i32 = arith.constant 0 : i32
    %c0_i32_0 = arith.constant 0 : i32
    return %arg0, %c0_i32 : i32, i32
  }
  func.func @transform_1(%arg0: i32) -> (i32, i32) {
    %c0_i32 = arith.constant 0 : i32
    %c0_i32_0 = arith.constant 0 : i32
    return %arg0, %c0_i32 : i32, i32
  }
  func.func @transform_2(%arg0: i32) -> (i32, i32) {
    %c0_i32 = arith.constant 0 : i32
    %c0_i32_0 = arith.constant 0 : i32
    %c0_i32_1 = arith.constant 0 : i32
    return %c0_i32, %c0_i32_0 : i32, i32
  }
  func.func @transform_3(%arg0: i32) -> (i32, i32) {
    %c0_i32 = arith.constant 0 : i32
    %c0_i32_0 = arith.constant 0 : i32
    %c0_i32_1 = arith.constant 0 : i32
    return %c0_i32, %c0_i32_0 : i32, i32
  }
  func.func @transform_4(%arg0: i32) -> (i32, i32) {
    %c0_i32 = arith.constant 0 : i32
    %c0_i32_0 = arith.constant 0 : i32
    return %arg0, %c0_i32 : i32, i32
  }
}

</mosaic_0001>

<bundles_post_ra>
// kernel: tpu_custom_call.1
= control target key start
LH: loop header
LB: loop body
LE: loop exit
PB: predicated region body
PF: predicated region fallthrough
CT: control target
= control target key end

     0   :  { %vm39_vm0 = vcmask 654336   ;;  %s481_s0 = inlined_call_operand.vmem [shape: f32[32,80], index: 0, kind: input, shape index: {}]   ;;  %s482_s1 = inlined_call_operand.vmem [shape: f32[2,32], index: 1, kind: input, shape index: {}]   ;;  %s483_s2 = inlined_call_operand.vmem [shape: f32[80,32], index: 2, kind: input, shape index: {}]   ;;  %s484_s3 = inlined_call_operand.vmem [shape: f32[1,32], index: 3, kind: input, shape index: {}]   ;;  %s485_s4 = inlined_call_operand.hbm [shape: f32[2,32], index: 4, kind: output, shape index: {}]  }
   0x1   :  { %v22_v0 = vld [vmem:[%s483_s2] sm:$0xff]  ;;  %v23_v1 = vld [vmem:[%s483_s2 + $0x8] sm:$0xff]  ;;  %v24_v2 = vld [vmem:[%s483_s2 + $0x10] sm:$0xff] }
   0x2   :  { %v318_v3 = vpack.c.bf16 %v23_v1, %v22_v0  ;;  %v25_v4 = vld [vmem:[%s483_s2 + $0x18] sm:$0xff]  ;;  %v26_v6 = vld [vmem:[%s483_s2 + $0x20] sm:$0xff]  ;;  %v27_v7 = vld [vmem:[%s483_s2 + $0x28] sm:$0xff] }
   0x3   :  { %v322_v5 = vpack.c.bf16 %v25_v4, %v24_v2  ;;  %v18_v8 = vld [vmem:[%s481_s0] sm:$0xff] }
   0x4   :  { %319 = vmatprep.subr.bf16.mxu0 %v318_v3  ;;  %301 = vmatprep.mubr.msk.f32.mxu0 %vm39_vm0, %v18_v8 }
   0x5   :  { %321 = vmatpush3.bf16.msra.mxu0 %v318_v3 }
   0x6   :  { %9 = vsyncpa [#allocation3], 0  ;;  %323 = vmatprep.subr.bf16.mxu0 %v322_v5  ;;  %v326_v9 = vpack.c.bf16 %v27_v7, %v26_v6  ;;  %v28_v10 = vld [vmem:[%s483_s2 + $0x30] sm:$0xff]  ;;  %v29_v11 = vld [vmem:[%s483_s2 + $0x38] sm:$0xff]  ;;  %v388_v19 = vmov 0.0|0.0   ;;  %vm389_vm1 = vmmov 0  }
   0x7   :  { %v330_v12 = vpack.c.bf16 %v29_v11, %v28_v10  ;;  %v30_v13 = vld [vmem:[%s483_s2 + $0x40] sm:$0xff]  ;;  %v31_v14 = vld [vmem:[%s483_s2 + $0x48] sm:$0xff]  ;;  %v20_v17 = vld [vmem:[%s481_s0 + $0x10] sm:$0xff]  ;;  %338 = vmatprep.subr.bf16.mxu1 %v388_v19  ;;  %v390_v20 = vmov 0.0   ;;  %vm162_vm2 = vcmask 261120   ;;  %s391_s18 = smov [#allocation2]  }
   0x8   :  { %v334_v15 = vpack.c.bf16 %v31_v14, %v30_v13  ;;  %v19_v16 = vld [vmem:[%s481_s0 + $0x8] sm:$0xff]  ;;  %v21_v18 = vld [vmem:[%s481_s0 + $0x18] sm:$0xff]  ;;  %315 = vmatprep.mubr.msk.f32.mxu1 %vm389_vm1, %v390_v20  ;;  %v252_v21 = vld [vmem:[%s484_s3] ss:$0 sm:$0xff]  ;;  %s244_s19 = sshll.u32 %s391_s18, 4  ;;  %vm236_vm3 = vcmask 254976   ;;  %s245_s19 = int_to_ptr.vmem [resolvable:$true] %s244_s19 }
   0x9   :  { %325 = vmatpush3.bf16.msra.mxu0 %v322_v5  ;;  %v161_v48 = vld [vmem:[%s482_s1] sm:$0x3]  ;;  %s364_s20 = scalar_lea.vmem %s245_s19, 32  ;;  %p369_p1 = scmp.lt.s32.totalorder %s245_s19, %s245_s19 }
   0xa   :  { %327 = vmatprep.subr.bf16.mxu0 %v326_v9  ;;  %p365_p0 = scmp.ne.s32.totalorder %s245_s19, %s364_s20  ;;  %p370_p2 = scmp.lt.s32.totalorder %s364_s20, %s364_s20 }
   0xc   :  { %p371_p3 = por %p370_p2, %p369_p1 }
   0xd   :  { %329 = vmatpush3.bf16.msra.mxu0 %v326_v9 }
   0xe   :  { %331 = vmatprep.subr.bf16.mxu0 %v330_v12  ;;  %p372_p4 = pnand %p371_p3, %p365_p0 }
  0x11   :  { %333 = vmatpush3.bf16.msra.mxu0 %v330_v12 }
  0x12   :  { %335 = vmatprep.subr.bf16.mxu0 %v334_v15 }
  0x15   :  { %337 = vmatpush3.bf16.msra.mxu0 %v334_v15 }
  0x18   :  { %302 = vmatmul.mubr.msk.f32.vlgmr.msra.gmra.mrb[0].mxu0 %vm39_vm0, %v19_v16 }
  0x19   :  { %304 = vmatprep.mubr.msk.f32.mxu0 %vm39_vm0, %v20_v17 }
  0x1c   :  { %305 = vmatmul.mubr.msk.f32.gmra.mrb[2].mxu0 %vm39_vm0, %v21_v18 }
  0xeb   :  { %v303_v22 = vpop.f32.mrb[0].mxu0 }
  0xec   :  { %v124_v23 = vadd.f32 %v303_v22, %v252_v21  ;;  %v118_v24 = vpop.f32.mrb[1].mxu0 }
  0xed   :  { %v119_v25 = vadd.f32 %v252_v21, %v118_v24 }
  0xee   :  { %v258_v26 = vmul.f32 -1.442695, %v124_v23 }
  0xef   :  { %v257_v27 = vmul.f32 -1.442695, %v119_v25  ;;  %v306_v28 = vpop.f32.mrb[2].mxu0 }
  0xf0   :  { %348 = vpow2.f32 %v258_v26  ;;  %v134_v29 = vadd.f32 %v306_v28, %v252_v21  ;;  %v128_v30 = vpop.f32.mrb[3].mxu0 }
  0xf1   :  { %350 = vpow2.f32 %v257_v27  ;;  %v129_v31 = vadd.f32 %v252_v21, %v128_v30 }
  0xf2   :  { %v260_v32 = vmul.f32 -1.442695, %v134_v29 }
  0xf3   :  { %v259_v33 = vmul.f32 -1.442695, %v129_v31 }
  0xf4   :  { %352 = vpow2.f32 %v260_v32 }
  0xf5   :  { %354 = vpow2.f32 %v259_v33 }
  0xfa   :  { %v349_v34 = vpop.eup %348 }
  0xfb   :  { %v351_v35 = vpop.eup %350  ;;  %v150_v36 = vadd.f32 1.0, %v349_v34 }
  0xfc   :  { %v149_v37 = vadd.f32 1.0, %v351_v35 }
  0xfd   :  { %356 = vrcp.f32 %v150_v36 }
  0xfe   :  { %v353_v38 = vpop.eup %352  ;;  %358 = vrcp.f32 %v149_v37 }
  0xff   :  { %v355_v39 = vpop.eup %354  ;;  %v152_v40 = vadd.f32 1.0, %v353_v38 }
 0x100   :  { %v151_v41 = vadd.f32 1.0, %v355_v39 }
 0x101   :  { %360 = vrcp.f32 %v152_v40 }
 0x102   :  { %362 = vrcp.f32 %v151_v41 }
 0x107   :  { %v357_v42 = vpop.eup %356 }
 0x108   :  { %v359_v43 = vpop.eup %358 }
 0x109   :  { %v339_v44 = vpack.c.bf16 %v357_v42, %v359_v43 }
 0x10b   :  { %v361_v45 = vpop.eup %360  ;;  %340 = vmatpush3.bf16.msra.mxu1 %v339_v44 }
 0x10c   :  { %v363_v46 = vpop.eup %362  ;;  %341 = vmatprep.subr.bf16.mxu1 %v388_v19 }
 0x10d   :  { %v342_v47 = vpack.c.bf16 %v361_v45, %v363_v46 }
 0x10f   :  { %343 = vmatpush3.bf16.msra.mxu1 %v342_v47 }
 0x112   :  { %316 = vmatmul.mubr.msk.f32.vlgmr.msra.gmra.mrb[0].mxu1 %vm162_vm2, %v161_v48 }
 0x1e5   :  { %v232_v49 = vpop.f32.mrb[0].mxu1 }
 0x1e6   :  { %237 = vst.msk [vmem:[#allocation2] sm:$0x3] %vm236_vm3, %v232_v49  ;;  %v317_v50 = vpop.f32.mrb[1].mxu1 }
 0x1e7   :  { %375 = shalt.err (!%p372_p4)
}
 0x1e8   :  { %s376_s1 = scalar_lea.hbm %s485_s4, 32 }
 0x1e9   :  { %p377_p5 = scmp.ne.s32.totalorder %s485_s4, %s376_s1  ;;  %p380_p6 = scmp.lt.u32.totalorder %s376_s1, %s485_s4 }
 0x1eb   :  { %p382_p7 = pnand %p380_p6, %p377_p5 }
 0x1ed   :  { %385 = shalt.err (!%p382_p7)
}
 0x1ee   :  { %247 = dma.vmem_to_hbm [thread:$0]  %s245_s19, 32, %s485_s4, [#allocation3]  }
 0x1ef   :  { %386 = dma.done.wait [#allocation3], 32  }
 0x1f0   :  { %387 = vsyncadd [#allocation3], 4294967264 }
 0x1f1   :  { %251 = vsyncpa [#allocation3], 1 }

</bundles_post_ra>
